<compile_context>
chip_gen: v5e
topology: v5e:2x2
jax: 0.10.0
libtpu: 0.0.40
codegen_flags: <defaults>
</compile_context>

<pallas_src>
import math

import jax
import jax.numpy as jnp
from jax import lax
from jax.experimental import pallas as pl
from jax.experimental.pallas import tpu as pltpu


# ----------------------------- config ------------------------------------ #
B = 2            # batch
T = 8            # sequence length
C = 32           # n_embd
N_HEAD = 4
HEAD_DIM = C // N_HEAD
EPS = 1e-5

HT = N_HEAD * T                  # 32 head-expanded key/value rows per batch
ATT_SCALE = 1.0 / math.sqrt(HEAD_DIM)

# Packed bias/scale slab: one vector per sublane row, lane offset 0.
VEC_ROWS = 16                    # multiple of 8
VEC_LANES = 4 * C                # 128, multiple of 128
(R_LN1_W, R_LN1_B, R_BQ, R_BK, R_BV, R_BPROJ,
 R_LN2_W, R_LN2_B, R_BFC, R_BPROJ2) = range(10)


# --------------------------- kernel helpers -------------------------------- #
def _layer_norm(x, w, b):
    # x: (T, C) f32; w/b: (1, C) f32.  Matches F.layer_norm (biased var, eps=1e-5).
    mean = jnp.mean(x, axis=-1, keepdims=True)
    xc = x - mean
    var = jnp.mean(xc * xc, axis=-1, keepdims=True)
    return xc * lax.rsqrt(var + EPS) * w + b


def _erf(x):
    # Abramowitz & Stegun 7.1.26, |abs err| <= 1.5e-7.
    # Only VALU ops + one EUP exp -> no reliance on a lax.erf Mosaic lowering.
    a1, a2, a3, a4, a5 = 0.254829592, -0.284496736, 1.421413741, -1.453152027, 1.061405429
    pp = 0.3275911
    ax = jnp.where(x >= 0.0, x, -x)
    t = 1.0 / (1.0 + pp * ax)
    poly = ((((a5 * t + a4) * t + a3) * t + a2) * t + a1) * t
    e = 1.0 - poly * jnp.exp(-(ax * ax))
    return jnp.where(x >= 0.0, e, -e)


def _gelu_exact(x):
    # PyTorch nn.GELU() default (exact, erf-based).
    return 0.5 * x * (1.0 + _erf(x * (1.0 / math.sqrt(2.0))))


# ------------------------------- kernel ------------------------------------ #
def block_kernel(
    x_ref,                     # (T, C)   one batch element
    vec_ref,                   # (16, 128) packed scale/bias vectors
    wq_ref,                    # (C, C)   Q weight, 1/sqrt(hd) pre-folded
    wk_ref, wv_ref,            # (C, C)   K / V weights
    wproj_ref,                 # (C, C)   attention output projection
    wfc_ref,                   # (C, 4C)  MLP up-projection
    wproj2_ref,                # (4C, C)  MLP down-projection
    cmask_ref,                 # (HT, C)  cmask[h*T+t, c] = 1 if c//hd == h else 0
    o_ref,                     # (T, C)
):
    f32 = jnp.float32
    x = x_ref[...].astype(f32)                                 # (T, C)

    ln1_w = vec_ref[R_LN1_W:R_LN1_W + 1, 0:C]
    ln1_b = vec_ref[R_LN1_B:R_LN1_B + 1, 0:C]
    bq = vec_ref[R_BQ:R_BQ + 1, 0:C]
    bk = vec_ref[R_BK:R_BK + 1, 0:C]
    bv = vec_ref[R_BV:R_BV + 1, 0:C]
    bproj = vec_ref[R_BPROJ:R_BPROJ + 1, 0:C]
    ln2_w = vec_ref[R_LN2_W:R_LN2_W + 1, 0:C]
    ln2_b = vec_ref[R_LN2_B:R_LN2_B + 1, 0:C]
    bfc = vec_ref[R_BFC:R_BFC + 1, 0:4 * C]
    bproj2 = vec_ref[R_BPROJ2:R_BPROJ2 + 1, 0:C]

    cmask = cmask_ref[...]                                     # (HT, C) 0/1

    # ---------------- attention branch ----------------
    h = _layer_norm(x, ln1_w, ln1_b)                           # (T, C)

    # Q already carries the 1/sqrt(hd) scale (folded into wq/bq on the host).
    q = jnp.dot(h, wq_ref[...], preferred_element_type=f32) + bq          # (T, C)

    # Head "relayout" as matmuls + masking: row j = hh*T + t2 of kx/vx holds
    # head hh's channels of k/v at token t2 (all other channels zeroed).
    hrep = jnp.concatenate([h] * N_HEAD, axis=0)               # (HT, C) sublane tile
    kx = (jnp.dot(hrep, wk_ref[...], preferred_element_type=f32) + bk) * cmask
    vx = (jnp.dot(hrep, wv_ref[...], preferred_element_type=f32) + bv) * cmask

    # All per-head scores in one NT matmul: s[t1, hh*T+t2] = <q_hh[t1], k_hh[t2]>*scale.
    s = jnp.einsum("td,sd->ts", q, kx, preferred_element_type=f32)        # (T, HT)

    # Subtract the per-row max (shared by all of that row's head segments):
    # softmax is shift-invariant per segment, so this is exact, and stable
    # unless a row's score range exceeds ~80 (not reachable at these scales).
    s = s - jnp.max(s, axis=-1, keepdims=True)
    p = jnp.exp(s)

    # Unnormalized attention output, already merged to (T, C) with head-major
    # channels (vx's mask kills cross-head terms), plus matching per-(row, head)
    # softmax denominators broadcast to the same (T, C) layout.
    y_un = jnp.dot(p, vx, preferred_element_type=f32)          # (T, C)
    denom = jnp.dot(p, cmask, preferred_element_type=f32)      # (T, C)

    # Normalize AFTER the PV matmul; EUP approx reciprocal + one Newton step.
    r = pl.reciprocal(denom, approx=True)
    r = r * (2.0 - denom * r)
    y = y_un * r

    y = jnp.dot(y, wproj_ref[...], preferred_element_type=f32) + bproj
    x = x + y

    # ---------------- MLP branch ----------------
    h2 = _layer_norm(x, ln2_w, ln2_b)                          # (T, C)
    m = jnp.dot(h2, wfc_ref[...], preferred_element_type=f32) + bfc       # (T, 4C)
    m = _gelu_exact(m)
    m = jnp.dot(m, wproj2_ref[...], preferred_element_type=f32) + bproj2  # (T, C)
    # TODO(synk): dropout (p>0, training mode) not implemented — eval-mode identity.

    o_ref[...] = (x + m).astype(o_ref.dtype)


# --------------------------- host-side prep -------------------------------- #
def pack_params(p):
    """One-time host-side parameter folding / packing (amortized across calls)."""
    wq = p["attn_w"][:, 0:C] * ATT_SCALE          # fold attention scale into Q
    wk = p["attn_w"][:, C:2 * C]
    wv = p["attn_w"][:, 2 * C:3 * C]
    bq = p["attn_b"][0:C] * ATT_SCALE
    bk = p["attn_b"][C:2 * C]
    bv = p["attn_b"][2 * C:3 * C]

    vec = jnp.zeros((VEC_ROWS, VEC_LANES), jnp.float32)
    rows = [
        (R_LN1_W, p["ln1_w"]), (R_LN1_B, p["ln1_b"]),
        (R_BQ, bq), (R_BK, bk), (R_BV, bv), (R_BPROJ, p["proj_b"]),
        (R_LN2_W, p["ln2_w"]), (R_LN2_B, p["ln2_b"]),
        (R_BFC, p["fc_b"]), (R_BPROJ2, p["proj2_b"]),
    ]
    for r, v in rows:
        vec = vec.at[r, 0:v.shape[0]].set(v.astype(jnp.float32))

    j = jnp.arange(HT)
    c = jnp.arange(C)
    cmask = ((j[:, None] // T) == (c[None, :] // HEAD_DIM)).astype(jnp.float32)

    return {
        "vec": vec, "wq": wq, "wk": wk, "wv": wv,
        "wproj": p["proj_w"], "wfc": p["fc_w"], "wproj2": p["proj2_w"],
        "cmask": cmask,
    }


# ------------------------------- wrapper ------------------------------------ #
def block_forward(x, kp):
    Bb, Tt, Cc = x.shape
    x2d = x.reshape(Bb * Tt, Cc)

    grid_spec = pltpu.PrefetchScalarGridSpec(
        num_scalar_prefetch=0,
        grid=(Bb,),
        in_specs=[
            pl.BlockSpec((Tt, Cc), lambda b: (b, 0)),                  # x (per batch)
            pl.BlockSpec((VEC_ROWS, VEC_LANES), lambda b: (0, 0)),     # packed vectors
            pl.BlockSpec((Cc, Cc), lambda b: (0, 0)),                  # wq (scaled)
            pl.BlockSpec((Cc, Cc), lambda b: (0, 0)),                  # wk
            pl.BlockSpec((Cc, Cc), lambda b: (0, 0)),                  # wv
            pl.BlockSpec((Cc, Cc), lambda b: (0, 0)),                  # proj_w
            pl.BlockSpec((Cc, 4 * Cc), lambda b: (0, 0)),              # fc_w
            pl.BlockSpec((4 * Cc, Cc), lambda b: (0, 0)),              # proj2_w
            pl.BlockSpec((HT, Cc), lambda b: (0, 0)),                  # cmask
        ],
        out_specs=pl.BlockSpec((Tt, Cc), lambda b: (b, 0)),
    )

    out2d = pl.pallas_call(
        block_kernel,
        out_shape=jax.ShapeDtypeStruct((Bb * Tt, Cc), x.dtype),
        grid_spec=grid_spec,
        compiler_params=pltpu.CompilerParams(
            dimension_semantics=("parallel",)),   # batches on separate TCs on v7x
    )(x2d, kp["vec"], kp["wq"], kp["wk"], kp["wv"], kp["wproj"],
      kp["wfc"], kp["wproj2"], kp["cmask"])

    return out2d.reshape(Bb, Tt, Cc)


# -------------------------- pure-JAX reference ----------------------------- #
def block_reference(x, p):
    def ln(v, w, b):
        mu = jnp.mean(v, axis=-1, keepdims=True)
        var = jnp.mean((v - mu) ** 2, axis=-1, keepdims=True)
        return (v - mu) / jnp.sqrt(var + EPS) * w + b

    h = ln(x, p["ln1_w"], p["ln1_b"])
    qkv = h @ p["attn_w"] + p["attn_b"]
    q, k, v = jnp.split(qkv, 3, axis=-1)

    def heads(t):  # (B,T,C) -> (B,H,T,hd)
        return t.reshape(B, T, N_HEAD, HEAD_DIM).transpose(0, 2, 1, 3)

    q, k, v = heads(q), heads(k), heads(v)
    att = jnp.einsum("bhtd,bhsd->bhts", q, k) / math.sqrt(HEAD_DIM)
    att = jax.nn.softmax(att, axis=-1)            # non-causal
    y = jnp.einsum("bhts,bhsd->bhtd", att, v)
    y = y.transpose(0, 2, 1, 3).reshape(B, T, C)
    y = y @ p["proj_w"] + p["proj_b"]
    x = x + y

    h2 = ln(x, p["ln2_w"], p["ln2_b"])
    m = h2 @ p["fc_w"] + p["fc_b"]
    m = 0.5 * m * (1.0 + lax.erf(m / math.sqrt(2.0)))   # exact GELU
    m = m @ p["proj2_w"] + p["proj2_b"]
    return x + m


# ------------------------------- main -------------------------------------- #
if __name__ == "__main__":
    key = jax.random.PRNGKey(0)
    keys = jax.random.split(key, 13)

    params = {
        "ln1_w": 1.0 + 0.1 * jax.random.normal(keys[8], (C,), jnp.float32),
        "ln1_b": 0.05 * jax.random.normal(keys[9], (C,), jnp.float32),
        "attn_w": 0.02 * jax.random.normal(keys[0], (C, 3 * C), jnp.float32),
        "attn_b": 0.01 * jax.random.normal(keys[1], (3 * C,), jnp.float32),
        "proj_w": 0.02 * jax.random.normal(keys[2], (C, C), jnp.float32),
        "proj_b": 0.01 * jax.random.normal(keys[3], (C,), jnp.float32),
        "ln2_w": 1.0 + 0.1 * jax.random.normal(keys[10], (C,), jnp.float32),
        "ln2_b": 0.05 * jax.random.normal(keys[11], (C,), jnp.float32),
        "fc_w": 0.02 * jax.random.normal(keys[4], (C, 4 * C), jnp.float32),
        "fc_b": 0.01 * jax.random.normal(keys[5], (4 * C,), jnp.float32),
        "proj2_w": 0.02 * jax.random.normal(keys[6], (4 * C, C), jnp.float32),
        "proj2_b": 0.01 * jax.random.normal(keys[7], (C,), jnp.float32),
    }

    x = jax.random.normal(keys[12], (B, T, C), jnp.float32)

    kp = pack_params(params)                       # one-time host-side prep
    out = jax.block_until_ready(block_forward(x, kp))

    ref = block_reference(x, params)
    assert out.shape == (B, T, C)
    max_err = jnp.max(jnp.abs(out - ref))
    assert jnp.allclose(out, ref, atol=2e-3, rtol=2e-3), (
        f"mismatch vs reference: max abs err {max_err}")

    print("KERNEL_OK")
</pallas_src>

<mosaic_0001>
module attributes {stable_mosaic.version = 11 : i64} {
  func.func @block_kernel(%arg0: i32, %arg1: memref<8x32xf32, #tpu.memory_space<vmem>>, %arg2: memref<16x128xf32, #tpu.memory_space<vmem>>, %arg3: memref<32x32xf32, #tpu.memory_space<vmem>>, %arg4: memref<32x32xf32, #tpu.memory_space<vmem>>, %arg5: memref<32x32xf32, #tpu.memory_space<vmem>>, %arg6: memref<32x32xf32, #tpu.memory_space<vmem>>, %arg7: memref<32x128xf32, #tpu.memory_space<vmem>>, %arg8: memref<128x32xf32, #tpu.memory_space<vmem>>, %arg9: memref<32x32xf32, #tpu.memory_space<vmem>>, %arg10: memref<8x32xf32, #tpu.memory_space<vmem>>) attributes {dimension_semantics = [#tpu.dimension_semantics<parallel>], iteration_bounds = array<i64: 2>, scalar_prefetch = 0 : i64, scratch_operands = 0 : i64, tpu.core_type = #tpu.core_type<tc>, window_params = [{transform_indices = @transform_0, window_bounds = array<i64: 8, 32>}, {pipeline_mode = #tpu.pipeline_mode<synchronous>, transform_indices = @transform_1, window_bounds = array<i64: 16, 128>}, {pipeline_mode = #tpu.pipeline_mode<synchronous>, transform_indices = @transform_2, window_bounds = array<i64: 32, 32>}, {pipeline_mode = #tpu.pipeline_mode<synchronous>, transform_indices = @transform_3, window_bounds = array<i64: 32, 32>}, {pipeline_mode = #tpu.pipeline_mode<synchronous>, transform_indices = @transform_4, window_bounds = array<i64: 32, 32>}, {pipeline_mode = #tpu.pipeline_mode<synchronous>, transform_indices = @transform_5, window_bounds = array<i64: 32, 32>}, {pipeline_mode = #tpu.pipeline_mode<synchronous>, transform_indices = @transform_6, window_bounds = array<i64: 32, 128>}, {pipeline_mode = #tpu.pipeline_mode<synchronous>, transform_indices = @transform_7, window_bounds = array<i64: 128, 32>}, {pipeline_mode = #tpu.pipeline_mode<synchronous>, transform_indices = @transform_8, window_bounds = array<i64: 32, 32>}, {transform_indices = @transform_9, window_bounds = array<i64: 8, 32>}]} {
    %c0 = arith.constant 0 : index
    %c0_0 = arith.constant 0 : index
    %0 = vector.load %arg1[%c0, %c0_0] : memref<8x32xf32, #tpu.memory_space<vmem>>, vector<8x32xf32>
    %c0_1 = arith.constant 0 : index
    %c0_2 = arith.constant 0 : index
    %1 = vector.load %arg2[%c0_1, %c0_2] : memref<16x128xf32, #tpu.memory_space<vmem>>, vector<1x32xf32>
    %c1 = arith.constant 1 : index
    %c0_3 = arith.constant 0 : index
    %2 = vector.load %arg2[%c1, %c0_3] : memref<16x128xf32, #tpu.memory_space<vmem>>, vector<1x32xf32>
    %c2 = arith.constant 2 : index
    %c0_4 = arith.constant 0 : index
    %3 = vector.load %arg2[%c2, %c0_4] : memref<16x128xf32, #tpu.memory_space<vmem>>, vector<1x32xf32>
    %c3 = arith.constant 3 : index
    %c0_5 = arith.constant 0 : index
    %4 = vector.load %arg2[%c3, %c0_5] : memref<16x128xf32, #tpu.memory_space<vmem>>, vector<1x32xf32>
    %c4 = arith.constant 4 : index
    %c0_6 = arith.constant 0 : index
    %5 = vector.load %arg2[%c4, %c0_6] : memref<16x128xf32, #tpu.memory_space<vmem>>, vector<1x32xf32>
    %c5 = arith.constant 5 : index
    %c0_7 = arith.constant 0 : index
    %6 = vector.load %arg2[%c5, %c0_7] : memref<16x128xf32, #tpu.memory_space<vmem>>, vector<1x32xf32>
    %c6 = arith.constant 6 : index
    %c0_8 = arith.constant 0 : index
    %7 = vector.load %arg2[%c6, %c0_8] : memref<16x128xf32, #tpu.memory_space<vmem>>, vector<1x32xf32>
    %c7 = arith.constant 7 : index
    %c0_9 = arith.constant 0 : index
    %8 = vector.load %arg2[%c7, %c0_9] : memref<16x128xf32, #tpu.memory_space<vmem>>, vector<1x32xf32>
    %c8 = arith.constant 8 : index
    %c0_10 = arith.constant 0 : index
    %9 = vector.load %arg2[%c8, %c0_10] : memref<16x128xf32, #tpu.memory_space<vmem>>, vector<1x128xf32>
    %c9 = arith.constant 9 : index
    %c0_11 = arith.constant 0 : index
    %10 = vector.load %arg2[%c9, %c0_11] : memref<16x128xf32, #tpu.memory_space<vmem>>, vector<1x32xf32>
    %c0_12 = arith.constant 0 : index
    %c0_13 = arith.constant 0 : index
    %11 = vector.load %arg9[%c0_12, %c0_13] : memref<32x32xf32, #tpu.memory_space<vmem>>, vector<32x32xf32>
    %cst = arith.constant dense<0.000000e+00> : vector<8xf32>
    %12 = vector.multi_reduction <add>, %0, %cst [1] : vector<8x32xf32> to vector<8xf32>
    %13 = vector.shape_cast %12 : vector<8xf32> to vector<8x1xf32>
    %cst_14 = arith.constant 3.200000e+01 : f32
    %14 = vector.broadcast %cst_14 : f32 to vector<8x1xf32>
    %15 = arith.divf %13, %14 : vector<8x1xf32>
    %16 = vector.broadcast %15 : vector<8x1xf32> to vector<8x32xf32>
    %17 = arith.subf %0, %16 : vector<8x32xf32>
    %18 = arith.mulf %17, %17 : vector<8x32xf32>
    %cst_15 = arith.constant dense<0.000000e+00> : vector<8xf32>
    %19 = vector.multi_reduction <add>, %18, %cst_15 [1] : vector<8x32xf32> to vector<8xf32>
    %20 = vector.shape_cast %19 : vector<8xf32> to vector<8x1xf32>
    %cst_16 = arith.constant 3.200000e+01 : f32
    %21 = vector.broadcast %cst_16 : f32 to vector<8x1xf32>
    %22 = arith.divf %20, %21 : vector<8x1xf32>
    %cst_17 = arith.constant 9.99999974E-6 : f32
    %23 = vector.broadcast %cst_17 : f32 to vector<8x1xf32>
    %24 = arith.addf %22, %23 : vector<8x1xf32>
    %25 = math.rsqrt %24 : vector<8x1xf32>
    %26 = vector.broadcast %25 : vector<8x1xf32> to vector<8x32xf32>
    %27 = arith.mulf %17, %26 : vector<8x32xf32>
    %28 = vector.broadcast %1 : vector<1x32xf32> to vector<8x32xf32>
    %29 = arith.mulf %27, %28 : vector<8x32xf32>
    %30 = vector.broadcast %2 : vector<1x32xf32> to vector<8x32xf32>
    %31 = arith.addf %29, %30 : vector<8x32xf32>
    %c0_18 = arith.constant 0 : index
    %c0_19 = arith.constant 0 : index
    %32 = vector.load %arg3[%c0_18, %c0_19] : memref<32x32xf32, #tpu.memory_space<vmem>>, vector<32x32xf32>
    %cst_20 = arith.constant dense<0.000000e+00> : vector<8x32xf32>
    %33 = tpu.matmul %31, %32, %cst_20 {dimension_numbers = #tpu.dot_dimension_numbers<[1], [0], [0], [1], [0, 0, 1, 1], [], []>} : vector<8x32xf32>, vector<32x32xf32>, vector<8x32xf32> -> vector<8x32xf32>
    %34 = vector.broadcast %3 : vector<1x32xf32> to vector<8x32xf32>
    %35 = arith.addf %33, %34 : vector<8x32xf32>
    %36 = tpu.concatenate %31, %31, %31, %31 in 0 : vector<8x32xf32>, vector<8x32xf32>, vector<8x32xf32>, vector<8x32xf32> -> vector<32x32xf32>
    %c0_21 = arith.constant 0 : index
    %c0_22 = arith.constant 0 : index
    %37 = vector.load %arg4[%c0_21, %c0_22] : memref<32x32xf32, #tpu.memory_space<vmem>>, vector<32x32xf32>
    %cst_23 = arith.constant dense<0.000000e+00> : vector<32x32xf32>
    %38 = tpu.matmul %36, %37, %cst_23 {dimension_numbers = #tpu.dot_dimension_numbers<[1], [0], [0], [1], [0, 0, 1, 1], [], []>} : vector<32x32xf32>, vector<32x32xf32>, vector<32x32xf32> -> vector<32x32xf32>
    %39 = vector.broadcast %4 : vector<1x32xf32> to vector<32x32xf32>
    %40 = arith.addf %38, %39 : vector<32x32xf32>
    %41 = arith.mulf %40, %11 : vector<32x32xf32>
    %c0_24 = arith.constant 0 : index
    %c0_25 = arith.constant 0 : index
    %42 = vector.load %arg5[%c0_24, %c0_25] : memref<32x32xf32, #tpu.memory_space<vmem>>, vector<32x32xf32>
    %cst_26 = arith.constant dense<0.000000e+00> : vector<32x32xf32>
    %43 = tpu.matmul %36, %42, %cst_26 {dimension_numbers = #tpu.dot_dimension_numbers<[1], [0], [0], [1], [0, 0, 1, 1], [], []>} : vector<32x32xf32>, vector<32x32xf32>, vector<32x32xf32> -> vector<32x32xf32>
    %44 = vector.broadcast %5 : vector<1x32xf32> to vector<32x32xf32>
    %45 = arith.addf %43, %44 : vector<32x32xf32>
    %46 = arith.mulf %45, %11 : vector<32x32xf32>
    "tpu.trace_start"() <{level = 10 : i32, message = "td,sd->ts"}> : () -> ()
    %cst_27 = arith.constant dense<0.000000e+00> : vector<8x32xf32>
    %47 = tpu.matmul %35, %41, %cst_27 {dimension_numbers = #tpu.dot_dimension_numbers<[1], [1], [0], [0], [0, 0, 1, 0], [], []>} : vector<8x32xf32>, vector<32x32xf32>, vector<8x32xf32> -> vector<8x32xf32>
    "tpu.trace_stop"() : () -> ()
    %cst_28 = arith.constant dense<0xFF800000> : vector<8xf32>
    %48 = vector.multi_reduction <maximumf>, %47, %cst_28 [1] : vector<8x32xf32> to vector<8xf32>
    %49 = vector.shape_cast %48 : vector<8xf32> to vector<8x1xf32>
    %50 = vector.broadcast %49 : vector<8x1xf32> to vector<8x32xf32>
    %51 = arith.subf %47, %50 : vector<8x32xf32>
    %52 = math.exp %51 : vector<8x32xf32>
    %cst_29 = arith.constant dense<0.000000e+00> : vector<8x32xf32>
    %53 = tpu.matmul %52, %46, %cst_29 {dimension_numbers = #tpu.dot_dimension_numbers<[1], [0], [0], [1], [0, 0, 1, 1], [], []>} : vector<8x32xf32>, vector<32x32xf32>, vector<8x32xf32> -> vector<8x32xf32>
    %cst_30 = arith.constant dense<0.000000e+00> : vector<8x32xf32>
    %54 = tpu.matmul %52, %11, %cst_30 {dimension_numbers = #tpu.dot_dimension_numbers<[1], [0], [0], [1], [0, 0, 1, 1], [], []>} : vector<8x32xf32>, vector<32x32xf32>, vector<8x32xf32> -> vector<8x32xf32>
    %55 = tpu.reciprocal %54 {approx = true} : vector<8x32xf32> -> vector<8x32xf32>
    %56 = arith.mulf %54, %55 : vector<8x32xf32>
    %cst_31 = arith.constant 2.000000e+00 : f32
    %57 = vector.broadcast %cst_31 : f32 to vector<8x32xf32>
    %58 = arith.subf %57, %56 : vector<8x32xf32>
    %59 = arith.mulf %55, %58 : vector<8x32xf32>
    %60 = arith.mulf %53, %59 : vector<8x32xf32>
    %c0_32 = arith.constant 0 : index
    %c0_33 = arith.constant 0 : index
    %61 = vector.load %arg6[%c0_32, %c0_33] : memref<32x32xf32, #tpu.memory_space<vmem>>, vector<32x32xf32>
    %cst_34 = arith.constant dense<0.000000e+00> : vector<8x32xf32>
    %62 = tpu.matmul %60, %61, %cst_34 {dimension_numbers = #tpu.dot_dimension_numbers<[1], [0], [0], [1], [0, 0, 1, 1], [], []>} : vector<8x32xf32>, vector<32x32xf32>, vector<8x32xf32> -> vector<8x32xf32>
    %63 = vector.broadcast %6 : vector<1x32xf32> to vector<8x32xf32>
    %64 = arith.addf %62, %63 : vector<8x32xf32>
    %65 = arith.addf %0, %64 : vector<8x32xf32>
    %cst_35 = arith.constant dense<0.000000e+00> : vector<8xf32>
    %66 = vector.multi_reduction <add>, %65, %cst_35 [1] : vector<8x32xf32> to vector<8xf32>
    %67 = vector.shape_cast %66 : vector<8xf32> to vector<8x1xf32>
    %cst_36 = arith.constant 3.200000e+01 : f32
    %68 = vector.broadcast %cst_36 : f32 to vector<8x1xf32>
    %69 = arith.divf %67, %68 : vector<8x1xf32>
    %70 = vector.broadcast %69 : vector<8x1xf32> to vector<8x32xf32>
    %71 = arith.subf %65, %70 : vector<8x32xf32>
    %72 = arith.mulf %71, %71 : vector<8x32xf32>
    %cst_37 = arith.constant dense<0.000000e+00> : vector<8xf32>
    %73 = vector.multi_reduction <add>, %72, %cst_37 [1] : vector<8x32xf32> to vector<8xf32>
    %74 = vector.shape_cast %73 : vector<8xf32> to vector<8x1xf32>
    %cst_38 = arith.constant 3.200000e+01 : f32
    %75 = vector.broadcast %cst_38 : f32 to vector<8x1xf32>
    %76 = arith.divf %74, %75 : vector<8x1xf32>
    %cst_39 = arith.constant 9.99999974E-6 : f32
    %77 = vector.broadcast %cst_39 : f32 to vector<8x1xf32>
    %78 = arith.addf %76, %77 : vector<8x1xf32>
    %79 = math.rsqrt %78 : vector<8x1xf32>
    %80 = vector.broadcast %79 : vector<8x1xf32> to vector<8x32xf32>
    %81 = arith.mulf %71, %80 : vector<8x32xf32>
    %82 = vector.broadcast %7 : vector<1x32xf32> to vector<8x32xf32>
    %83 = arith.mulf %81, %82 : vector<8x32xf32>
    %84 = vector.broadcast %8 : vector<1x32xf32> to vector<8x32xf32>
    %85 = arith.addf %83, %84 : vector<8x32xf32>
    %c0_40 = arith.constant 0 : index
    %c0_41 = arith.constant 0 : index
    %86 = vector.load %arg7[%c0_40, %c0_41] : memref<32x128xf32, #tpu.memory_space<vmem>>, vector<32x128xf32>
    %cst_42 = arith.constant dense<0.000000e+00> : vector<8x128xf32>
    %87 = tpu.matmul %85, %86, %cst_42 {dimension_numbers = #tpu.dot_dimension_numbers<[1], [0], [0], [1], [0, 0, 1, 1], [], []>} : vector<8x32xf32>, vector<32x128xf32>, vector<8x128xf32> -> vector<8x128xf32>
    %88 = vector.broadcast %9 : vector<1x128xf32> to vector<8x128xf32>
    %89 = arith.addf %87, %88 : vector<8x128xf32>
    %cst_43 = arith.constant 5.000000e-01 : f32
    %90 = vector.broadcast %cst_43 : f32 to vector<8x128xf32>
    %91 = arith.mulf %90, %89 : vector<8x128xf32>
    %cst_44 = arith.constant 0.707106769 : f32
    %92 = vector.broadcast %cst_44 : f32 to vector<8x128xf32>
    %93 = arith.mulf %89, %92 : vector<8x128xf32>
    %cst_45 = arith.constant 0.000000e+00 : f32
    %94 = vector.broadcast %cst_45 : f32 to vector<8x128xf32>
    %95 = arith.cmpf oge, %93, %94 : vector<8x128xf32>
    %cst_46 = arith.constant 0.000000e+00 : f32
    %96 = vector.broadcast %cst_46 : f32 to vector<8x128xf32>
    %97 = arith.subf %96, %93 : vector<8x128xf32>
    %98 = arith.select %95, %93, %97 : vector<8x128xi1>, vector<8x128xf32>
    %cst_47 = arith.constant 0.327591091 : f32
    %99 = vector.broadcast %cst_47 : f32 to vector<8x128xf32>
    %100 = arith.mulf %99, %98 : vector<8x128xf32>
    %cst_48 = arith.constant 1.000000e+00 : f32
    %101 = vector.broadcast %cst_48 : f32 to vector<8x128xf32>
    %102 = arith.addf %101, %100 : vector<8x128xf32>
    %cst_49 = arith.constant 1.000000e+00 : f32
    %103 = vector.broadcast %cst_49 : f32 to vector<8x128xf32>
    %104 = arith.divf %103, %102 : vector<8x128xf32>
    %cst_50 = arith.constant 1.06140542 : f32
    %105 = vector.broadcast %cst_50 : f32 to vector<8x128xf32>
    %106 = arith.mulf %105, %104 : vector<8x128xf32>
    %cst_51 = arith.constant -1.45315206 : f32
    %107 = vector.broadcast %cst_51 : f32 to vector<8x128xf32>
    %108 = arith.addf %106, %107 : vector<8x128xf32>
    %109 = arith.mulf %108, %104 : vector<8x128xf32>
    %cst_52 = arith.constant 1.42141378 : f32
    %110 = vector.broadcast %cst_52 : f32 to vector<8x128xf32>
    %111 = arith.addf %109, %110 : vector<8x128xf32>
    %112 = arith.mulf %111, %104 : vector<8x128xf32>
    %cst_53 = arith.constant -0.284496725 : f32
    %113 = vector.broadcast %cst_53 : f32 to vector<8x128xf32>
    %114 = arith.addf %112, %113 : vector<8x128xf32>
    %115 = arith.mulf %114, %104 : vector<8x128xf32>
    %cst_54 = arith.constant 0.254829586 : f32
    %116 = vector.broadcast %cst_54 : f32 to vector<8x128xf32>
    %117 = arith.addf %115, %116 : vector<8x128xf32>
    %118 = arith.mulf %117, %104 : vector<8x128xf32>
    %119 = arith.mulf %98, %98 : vector<8x128xf32>
    %cst_55 = arith.constant 0.000000e+00 : f32
    %120 = vector.broadcast %cst_55 : f32 to vector<8x128xf32>
    %121 = arith.subf %120, %119 : vector<8x128xf32>
    %122 = math.exp %121 : vector<8x128xf32>
    %123 = arith.mulf %118, %122 : vector<8x128xf32>
    %cst_56 = arith.constant 1.000000e+00 : f32
    %124 = vector.broadcast %cst_56 : f32 to vector<8x128xf32>
    %125 = arith.subf %124, %123 : vector<8x128xf32>
    %cst_57 = arith.constant 0.000000e+00 : f32
    %126 = vector.broadcast %cst_57 : f32 to vector<8x128xf32>
    %127 = arith.cmpf oge, %93, %126 : vector<8x128xf32>
    %cst_58 = arith.constant 0.000000e+00 : f32
    %128 = vector.broadcast %cst_58 : f32 to vector<8x128xf32>
    %129 = arith.subf %128, %125 : vector<8x128xf32>
    %130 = arith.select %127, %125, %129 : vector<8x128xi1>, vector<8x128xf32>
    %cst_59 = arith.constant 1.000000e+00 : f32
    %131 = vector.broadcast %cst_59 : f32 to vector<8x128xf32>
    %132 = arith.addf %131, %130 : vector<8x128xf32>
    %133 = arith.mulf %91, %132 : vector<8x128xf32>
    %c0_60 = arith.constant 0 : index
    %c0_61 = arith.constant 0 : index
    %134 = vector.load %arg8[%c0_60, %c0_61] : memref<128x32xf32, #tpu.memory_space<vmem>>, vector<128x32xf32>
    %cst_62 = arith.constant dense<0.000000e+00> : vector<8x32xf32>
    %135 = tpu.matmul %133, %134, %cst_62 {dimension_numbers = #tpu.dot_dimension_numbers<[1], [0], [0], [1], [0, 0, 1, 1], [], []>} : vector<8x128xf32>, vector<128x32xf32>, vector<8x32xf32> -> vector<8x32xf32>
    %136 = vector.broadcast %10 : vector<1x32xf32> to vector<8x32xf32>
    %137 = arith.addf %135, %136 : vector<8x32xf32>
    %138 = arith.addf %65, %137 : vector<8x32xf32>
    %c0_63 = arith.constant 0 : index
    %c0_64 = arith.constant 0 : index
    %139 = vector.load %arg10[%c0_63, %c0_64] : memref<8x32xf32, #tpu.memory_space<vmem>>, vector<8x32xf32>
    tpu.vector_store %arg10[%c0_63, %c0_64], %138 {strides = array<i32>} : memref<8x32xf32, #tpu.memory_space<vmem>>, vector<8x32xf32>,
    return
  }
  func.func @transform_0(%arg0: i32) -> (i32, i32) {
    %c0_i32 = arith.constant 0 : i32
    %c0_i32_0 = arith.constant 0 : i32
    return %arg0, %c0_i32 : i32, i32
  }
  func.func @transform_1(%arg0: i32) -> (i32, i32) {
    %c0_i32 = arith.constant 0 : i32
    %c0_i32_0 = arith.constant 0 : i32
    %c0_i32_1 = arith.constant 0 : i32
    return %c0_i32, %c0_i32_0 : i32, i32
  }
  func.func @transform_2(%arg0: i32) -> (i32, i32) {
    %c0_i32 = arith.constant 0 : i32
    %c0_i32_0 = arith.constant 0 : i32
    %c0_i32_1 = arith.constant 0 : i32
    return %c0_i32, %c0_i32_0 : i32, i32
  }
  func.func @transform_3(%arg0: i32) -> (i32, i32) {
    %c0_i32 = arith.constant 0 : i32
    %c0_i32_0 = arith.constant 0 : i32
    %c0_i32_1 = arith.constant 0 : i32
    return %c0_i32, %c0_i32_0 : i32, i32
  }
  func.func @transform_4(%arg0: i32) -> (i32, i32) {
    %c0_i32 = arith.constant 0 : i32
    %c0_i32_0 = arith.constant 0 : i32
    %c0_i32_1 = arith.constant 0 : i32
    return %c0_i32, %c0_i32_0 : i32, i32
  }
  func.func @transform_5(%arg0: i32) -> (i32, i32) {
    %c0_i32 = arith.constant 0 : i32
    %c0_i32_0 = arith.constant 0 : i32
    %c0_i32_1 = arith.constant 0 : i32
    return %c0_i32, %c0_i32_0 : i32, i32
  }
  func.func @transform_6(%arg0: i32) -> (i32, i32) {
    %c0_i32 = arith.constant 0 : i32
    %c0_i32_0 = arith.constant 0 : i32
    %c0_i32_1 = arith.constant 0 : i32
    return %c0_i32, %c0_i32_0 : i32, i32
  }
  func.func @transform_7(%arg0: i32) -> (i32, i32) {
    %c0_i32 = arith.constant 0 : i32
    %c0_i32_0 = arith.constant 0 : i32
    %c0_i32_1 = arith.constant 0 : i32
    return %c0_i32, %c0_i32_0 : i32, i32
  }
  func.func @transform_8(%arg0: i32) -> (i32, i32) {
    %c0_i32 = arith.constant 0 : i32
    %c0_i32_0 = arith.constant 0 : i32
    %c0_i32_1 = arith.constant 0 : i32
    return %c0_i32, %c0_i32_0 : i32, i32
  }
  func.func @transform_9(%arg0: i32) -> (i32, i32) {
    %c0_i32 = arith.constant 0 : i32
    %c0_i32_0 = arith.constant 0 : i32
    return %arg0, %c0_i32 : i32, i32
  }
}

</mosaic_0001>

<bundles_post_ra>
// kernel: tpu_custom_call.1
= control target key start
LH: loop header
LB: loop body
LE: loop exit
PB: predicated region body
PF: predicated region fallthrough
CT: control target
= control target key end

     0   :  { %s1541_s0 = inlined_call_operand.hbm [shape: f32[16,32], index: 0, kind: input, shape index: {}]   ;;  %s1542_s1 = inlined_call_operand.hbm [shape: f32[16,128], index: 1, kind: input, shape index: {}]   ;;  %s1543_s2 = inlined_call_operand.vmem [shape: f32[32,32], index: 2, kind: input, shape index: {}]   ;;  %s1544_s3 = inlined_call_operand.vmem [shape: f32[32,32], index: 3, kind: input, shape index: {}]   ;;  %s1545_s4 = inlined_call_operand.vmem [shape: f32[32,32], index: 4, kind: input, shape index: {}]   ;;  %s1546_s5 = inlined_call_operand.vmem [shape: f32[32,32], index: 5, kind: input, shape index: {}]   ;;  %s1547_s6 = inlined_call_operand.vmem [shape: f32[32,128], index: 6, kind: input, shape index: {}]   ;;  %s1548_s7 = inlined_call_operand.vmem [shape: f32[128,32], index: 7, kind: input, shape index: {}]   ;;  %s1549_s8 = inlined_call_operand.hbm [shape: f32[32,32], index: 8, kind: input, shape index: {}]   ;;  %s1550_s9 = inlined_call_operand.hbm [shape: f32[16,32], index: 9, kind: output, shape index: {}]  }
   0x1   :  { %1552 = sst [smem:[#allocation14_spill]] %s1542_s1 }
   0x2   :  { %1553 = sst [smem:[#allocation15_spill]] %s1549_s8 }
   0x3   :  { %14 = vsyncpa [#allocation3], 0 }
   0x4   :  { %16 = vsyncpa [#allocation3 + $0x1], 0 }
   0x5   :  { %17 = vsyncpa [#allocation6], 0 }
   0x6   :  { %18 = vsyncpa [#allocation4], 0 }
   0x7   :  { %20 = vsyncpa [#allocation4 + $0x1], 0  ;;  %s1238_s30 = smov 0   ;;  %s1240_s10 = smov 0  }
   0x8   :  { %s1242_s11 = smov 0   ;;  %s1244_s12 = smov 0  }
   0x9 LB: > { %1554 = sst [smem:[#allocation12_spill]] %s1177_s11  ;;  %s1262_s16 = sadd.s32 4294967295, %s1181_s12   ;;  %s1181_s12 = sphi %s1244_s12, %s1569_s12   ;;  %s1177_s11 = sphi %s1242_s11, %s1566_s11   ;;  %s1173_s10 = sphi %s1240_s10, %s1568_s10   ;;  %s1169_s30 = sphi %s1238_s30, %s1567_s30  }
   0xa   : > { %s1555_s1 = sld [smem:[#allocation14_spill]]  ;;  %p894_p0 = scmp.ge.s32.totalorder %s1181_s12, 1 }
   0xb   : > { %p47_p1 = scmp.eq.s32.totalorder %s1262_s16, 0  ;;  %p251_p2 = scmp.lt.s32.totalorder %s1181_s12, 3 }
   0xc   : > { %s1183_s18 = smov [#allocation5]   ;;  %s1557_s8 = sld [smem:[#allocation15_spill]] }
   0xd   : > { %p1267_p3 = pnand %p894_p0, %p251_p2  ;;  %s264_s19 = sshll.u32 %s1183_s18, 4  ;;  %s265_s19 = int_to_ptr.vmem [resolvable:$true] %s264_s19 }
   0xe   : > { %s1184_s23 = smov [#allocation7]   ;;  %s1185_s25 = smov 128  }
   0xf   : > { %p939_p4 = pneg %p1267_p3  ;;  %s296_s24 = sshll.u32 %s1184_s23, 4  ;;  %s297_s24 = int_to_ptr.vmem [resolvable:$true] %s296_s24 }
  0x10   : > { %s262_s15 = sshll.u32 %s1555_s1, 4  ;;  %s1186_s26 = smov 8   ;;  %s263_s15 = int_to_ptr.hbm [resolvable:$true] %s262_s15 }
  0x11   : > { %p940_p6 = pnand %p939_p4, %p47_p1  ;;  %s893_s27 = sadd.s32 4294967294, %s1181_s12  }
  0x12   : > { %s294_s22 = sshll.u32 %s1557_s8, 4  ;;  %s1281_s28 = sadd.s32 1, %s1181_s12   ;;  %s295_s22 = int_to_ptr.hbm [resolvable:$true] %s294_s22 }
  0x13   : > { %942 = dma.hbm_to_vmem [thread:$0]  (!%p940_p6), %s263_s15, 256, %s265_s19, [#allocation6], %s1185_s25, %s1185_s25, %s1186_s26  }
  0x14   : > { %945 = dma.hbm_to_vmem [thread:$0]  (!%p940_p6), %s295_s22, 512, %s297_s24, [#allocation6], %s1185_s25, %s1185_s25, %s1186_s26  }
  0x15   : > { %s30_s29 = ssub.s32 %s1181_s12, %s1281_s28  ;;  %s33_s13 = sadd.s32 1, %s1177_s11 }
  0x16   : > { %p31_p7 = scmp.eq.s32.totalorder %s30_s29, 0  ;;  %p40_p8 = scmp.ne.s32.totalorder %s1177_s11, %s1173_s10 }
  0x17   : > { %p41_p9 = scmp.eq.s32.totalorder %s1181_s12, 0  ;;  %p46_p10 = scmp.ne.s32.totalorder %s1173_s10, %s1169_s30 }
  0x18   : > { %s1292_s14 = scalar_select %p31_p7, %s1177_s11, %s33_s13  }
  0x19   : > { %p1294_p11 = por %p41_p9, %p40_p8  ;;  %p1300_p12 = por %p47_p1, %p46_p10 }
  0x1a   : > { %1558 = sst [smem:[#allocation13_spill]] %s1292_s14  ;;  %p238_p13 = scmp.eq.s32.totalorder %s1262_s16, 1 }
  0x1b   : > { %p244_p0 = scmp.eq.s32.totalorder %s893_s27, 1  ;;  %p956_p2 = scmp.lt.s32.totalorder %s1181_s12, 2 }
  0x1c   : > { %s310_s19 = sand.u32 1, %s1177_s11   ;;  %p1307_p4 = por %p238_p13, %p40_p8 }
  0x1d   : > { %p1311_p6 = por %p244_p0, %p46_p10  ;;  %s898_s22 = sshll.u32 %s310_s19, 3 }
  0x1e   : > { %s899_s23 = sshll.u32 %s1181_s12, 3  ;;  %s314_s29 = scalar_lea.vmem [#allocation2], %s898_s22 }
  0x1f   : > { %s318_s26 = scalar_lea.hbm %s1541_s0, %s899_s23  ;;  %s322_s13 = sshll.u32 %s314_s29, 4  ;;  %s323_s13 = int_to_ptr.vmem [resolvable:$true] %s322_s13 }
  0x20   : > { %s320_s1 = sshll.u32 %s318_s26, 4  ;;  %p1321_p7 = pnand %p956_p2, %p1294_p11  ;;  %s321_s1 = int_to_ptr.hbm [resolvable:$true] %s320_s1 }
  0x21   : > { %s311_s8 = scalar_lea.sflag [#allocation3], %s310_s19  ;;  %s1081_s14 = sshra.s32 %s321_s1, 4  ;;  %s1082_s14 = int_to_ptr.hbm [resolvable:$true] %s1081_s14 }
  0x22   : > { %s1083_s11 = scalar_lea.hbm %s1082_s14, 8  ;;  %p1085_p9 = pneg %p1321_p7 }
  0x23   : > { %p1084_p8 = scmp.ne.s32.totalorder %s1082_s14, %s1083_s11  ;;  %s1088_s24 = scalar_lea.hbm %s1541_s0, 16 }
  0x24   : > { %p1089_p11 = scmp.lt.s32.totalorder %s1082_s14, %s1541_s0  ;;  %p1090_p0 = scmp.lt.s32.totalorder %s1088_s24, %s1083_s11 }
  0x25   : > { %p1086_p10 = pnand %p1085_p9, %p1084_p8 }
  0x26   : > { %p1091_p2 = por %p1090_p0, %p1089_p11 }
  0x27   : > { %p1087_p13 = pneg %p1086_p10 }
  0x29   : > { %p1092_p5 = pnand %p1091_p2, %p1087_p13 }
  0x2b   : > { %1095 = shalt.err (!%p1092_p5)
}
  0x2c   : > { %949 = dma.hbm_to_vmem [thread:$0]  (!%p1321_p7), %s321_s1, 128, %s323_s13, %s311_s8  }
  0x2d   : > { %331 = sbr.rel (%p1267_p3) target bundleno = 1620 (0x654), region = 56  ;;  %s1338_s19 = sand.u32 (!%p1267_p3), 1, %s1173_s10  }
  0x2e   : > { %s901_s26 = sshll.u32 (!%p1267_p3), %s1338_s19, 3  ;;  %s334_s29 = scalar_lea.sflag (!%p1267_p3), [#allocation3], %s1338_s19 }
  0x2f   : > { %s337_s11 = scalar_lea.vmem (!%p1267_p3), [#allocation2], %s901_s26 }
  0x32   : > { %1156 = dma.done.wait (%p1300_p12), %s334_s29, 128  }
  0x33   : > { %1158 = vsyncadd (%p1300_p12), %s334_s29, 4294967168 }
  0x34   : > { %1160 = dma.done.wait (%p47_p1), [#allocation6], 768  }
  0x35   : > { %1162 = vsyncadd (%p47_p1), [#allocation6], 4294966528  ;;  %vm398_vm0 = vcmask 261120   ;;  %v1352_v0 = vld [vmem:[%s337_s11] sm:$0xff]  ;;  %v1187_v2 = vmov 32.0   ;;  %v435_v14 = vld [vmem:[%s1543_s2 + $0x18] sm:$0xff] }
  0x36   : > { %v399_v1 = vsel %vm398_vm0, %v1352_v0, 0.0  ;;  %1007 = vrcp.f32 %v1187_v2  ;;  %v463_v15 = vld [vmem:[%s1544_s3 + $0x18] sm:$0xff]  ;;  %452 = vmatpush.msra.mxu0 %v435_v14  ;;  %v434_v17 = vld [vmem:[%s1543_s2 + $0x10] sm:$0xff]  ;;  %v433_v20 = vld [vmem:[%s1543_s2 + $0x8] sm:$0xff]  ;;  %s924_s17 = sshll.u32 %s1262_s16, 3  ;;  %s382_s27 = scalar_lea.vmem [#allocation8], %s901_s26 }
  0x37   : > { %400 = vadd.xlane.f32.xlu0 %v399_v1  ;;  %v501_v16 = vld [vmem:[%s1545_s4 + $0x18] sm:$0xff]  ;;  %477 = vmatpush.msra.mxu1 %v463_v15  ;;  %v462_v18 = vld [vmem:[%s1544_s3 + $0x10] sm:$0xff]  ;;  %v461_v21 = vld [vmem:[%s1544_s3 + $0x8] sm:$0xff]  ;;  %s799_s13 = scalar_lea.hbm %s1550_s9, %s924_s17  ;;  %s801_s22 = sshll.u32 %s382_s27, 4  ;;  %s802_s22 = int_to_ptr.vmem [resolvable:$true] %s801_s22 }
  0x38   : > { %515 = vmatpush.msra.mxu2 %v501_v16  ;;  %v500_v19 = vld [vmem:[%s1545_s4 + $0x10] sm:$0xff]  ;;  %453 = vmatpush.msra.mxu0 %v434_v17  ;;  %v499_v22 = vld [vmem:[%s1545_s4 + $0x8] sm:$0xff]  ;;  %v432_v23 = vld [vmem:[%s1543_s2] sm:$0xff]  ;;  %s803_s23 = sshll.u32 %s799_s13, 4  ;;  %s789_s24 = scalar_lea.sflag [#allocation4], %s1338_s19  ;;  %s804_s23 = int_to_ptr.hbm [resolvable:$true] %s803_s23 }
  0x39   : > { %478 = vmatpush.msra.mxu1 %v462_v18  ;;  %v460_v24 = vld [vmem:[%s1544_s3] sm:$0xff]  ;;  %v997_v35 = vld [vmem:[#allocation5] ss:$0 sm:$0xff]  ;;  %v998_v37 = vld [vmem:[#allocation5 + $0x1] ss:$0 sm:$0xff]  ;;  %s1125_s16 = sshra.s32 %s804_s23, 4  ;;  %s1126_s16 = int_to_ptr.hbm [resolvable:$true] %s1125_s16 }
  0x3a   : > { %516 = vmatpush.msra.mxu2 %v500_v19  ;;  %454 = vmatpush.msra.mxu0 %v433_v20  ;;  %v498_v25 = vld [vmem:[%s1545_s4] sm:$0xff]  ;;  %v1000_v46 = vld [vmem:[#allocation5 + $0x3] ss:$0 sm:$0xff]  ;;  %v397_v49 = vld [vmem:[#allocation7 + $0x18] sm:$0xff]  ;;  %s1127_s25 = scalar_lea.hbm %s1126_s16, 8  ;;  %s1131_s26 = scalar_lea.hbm %s1550_s9, 16 }
  0x3b   : > { %479 = vmatpush.msra.mxu1 %v461_v21  ;;  %v396_v53 = vld [vmem:[#allocation7 + $0x10] sm:$0xff]  ;;  %v395_v58 = vld [vmem:[#allocation7 + $0x8] sm:$0xff]  ;;  %v394_v2 = vld [vmem:[#allocation7] sm:$0xff]  ;;  %p1128_p1 = scmp.ne.s32.totalorder %s1126_s16, %s1127_s25  ;;  %p1132_p12 = scmp.lt.s32.totalorder %s1126_s16, %s1550_s9 }
  0x3c   : > { %v1008_v3 = vpop.eup %1007  ;;  %517 = vmatpush.msra.mxu2 %v499_v22  ;;  %455 = vmatpush.msra.mxu0 %v432_v23  ;;  %v1001_v54 = vld [vmem:[#allocation5 + $0x4] ss:$0 sm:$0xff]  ;;  %v628_v18 = vld [vmem:[%s1546_s5 + $0x18] sm:$0xff]  ;;  %v626_v20 = vld [vmem:[%s1546_s5 + $0x8] sm:$0xff]  ;;  %p1133_p7 = scmp.lt.s32.totalorder %s1131_s26, %s1127_s25 }
  0x3d   : > { %v403_v4 = vmul.f32 32.0, %v1008_v3  ;;  %vm407_vm1 = vweird.f32 %v1008_v3  ;;  %480 = vmatpush.msra.mxu1 %v460_v24  ;;  %v627_v19 = vld [vmem:[%s1546_s5 + $0x10] sm:$0xff]  ;;  %v625_v21 = vld [vmem:[%s1546_s5] sm:$0xff]  ;;  %p1129_p3 = pnand %p1128_p1, %p1307_p4 }
  0x3e   : > { %518 = vmatpush.msra.mxu2 %v498_v25  ;;  %p1134_p8 = por %p1133_p7, %p1132_p12 }
  0x3f   : > { %v404_v5 = vsub.f32 1.0, %v403_v4  ;;  %p1130_p5 = pneg %p1129_p3 }
  0x41   : > { %v405_v6 = vmul.f32 %v1008_v3, %v404_v5  ;;  %v999_v5 = vld [vmem:[#allocation5 + $0x2] ss:$0 sm:$0xff]  ;;  %p1135_p9 = pnand %p1134_p8, %p1130_p5 }
  0x43   : > { %v406_v7 = vadd.f32 %v1008_v3, %v405_v6 }
  0x45   : > { %v1356_v8 = vsel %vm407_vm1, %v1008_v3, %v406_v7 }
  0xaa   : > { %v401_v9 = vpop.xlane.xlu0 %400 }
  0xab   : > { %v409_v10 = vmul.f32 %v1356_v8, %v401_v9 }
  0xad   : > { %v410_v11 = vsub.f32 %v1352_v0, %v409_v10 }
  0xaf   : > { %v411_v12 = vmul.f32 %v410_v11, %v410_v11 }
  0xb1   : > { %v412_v13 = vsel %vm398_vm0, %v411_v12, 0.0 }
  0xb2   : > { %413 = vadd.xlane.f32.xlu0 %v412_v13 }
 0x125   : > { %v414_v26 = vpop.xlane.xlu0 %413 }
 0x126   : > { %v415_v27 = vmul.f32 %v414_v26, %v1356_v8 }
 0x128   : > { %v416_v28 = vadd.f32 1e-05, %v415_v27 }
 0x12a   : > { %1009 = vrsqrt.f32 %v416_v28  ;;  %vm423_vm3 = vweird.f32 %v416_v28 }
 0x130   : > { %v1010_v29 = vpop.eup %1009 }
 0x131   : > { %v418_v30 = vmul.f32 %v1010_v29, %v416_v28  ;;  %vm424_vm2 = vweird.f32 %v1010_v29 }
 0x132   : > { %vm425_vm4 = vmor %vm423_vm3, %vm424_vm2 }
 0x133   : > { %v419_v31 = vmul.f32 %v1010_v29, %v418_v30 }
 0x135   : > { %v420_v32 = vmul.f32 0.5, %v419_v31 }
 0x137   : > { %v421_v33 = vsub.f32 1.5, %v420_v32 }
 0x139   : > { %v422_v34 = vmul.f32 %v1010_v29, %v421_v33 }
 0x13b   : > { %v426_v36 = vsel %vm425_vm4, %v1010_v29, %v422_v34  ;;  %v1002_v29 = vld [vmem:[#allocation5 + $0x5] ss:$0 sm:$0xff] }
 0x13c   : > { %v427_v38 = vmul.f32 %v426_v36, %v410_v11 }
 0x13e   : > { %v429_v39 = vmul.f32 %v997_v35, %v427_v38 }
 0x140   : > { %v431_v40 = vadd.f32 %v998_v37, %v429_v39  ;;  %v683_v39 = vld [vmem:[%s1547_s6 + $0x18] sm:$0xff] }
 0x142   : > { %905 = vmatmul.msk.f32.vlgmr.msra.gmra.mxu0 %vm398_vm0, %v431_v40  ;;  %906 = vmatmul.msk.f32.vlgmr.msra.gmra.mxu1 %vm398_vm0, %v431_v40 }
 0x143   : > { %910 = vmatmul.msk.f32.vlgmr.msra.gmra.mxu2 %vm398_vm0, %v431_v40 }
 0x14a   : > { %907 = vmatmul.msk.f32.gmra.mxu1 %vm398_vm0, %v431_v40 }
 0x14b   : > { %911 = vmatmul.msk.f32.gmra.mxu2 %vm398_vm0, %v431_v40 }
 0x152   : > { %908 = vmatmul.msk.f32.gmra.mxu1 %vm398_vm0, %v431_v40 }
 0x153   : > { %912 = vmatmul.msk.f32.gmra.mxu2 %vm398_vm0, %v431_v40 }
 0x15a   : > { %909 = vmatmul.msk.f32.gmra.mxu1 %vm398_vm0, %v431_v40 }
 0x15b   : > { %913 = vmatmul.msk.f32.gmra.mxu2 %vm398_vm0, %v431_v40  ;;  %v681_v40 = vld [vmem:[%s1547_s6 + $0x8] sm:$0xff] }
 0x1bf   : > { %v482_v41 = vpop.f32.mrf.mxu1  ;;  %v457_v7 = vpop.f32.mrf.mxu0 }
 0x1c0   : > { %v483_v63 = vadd.f32 %v1000_v46, %v482_v41  ;;  %v458_v11 = vadd.f32 %v999_v5, %v457_v7  ;;  %v680_v41 = vld [vmem:[%s1547_s6] sm:$0xff]  ;;  %v756_v7 = vld [vmem:[%s1548_s7 + $0x38] sm:$0xff] }
 0x1c1   : > { %v757_v5 = vld [vmem:[%s1548_s7 + $0x40] sm:$0xff] }
 0x1c2   : > { %v494_v9 = vmul.f32 %v483_v63, %v394_v2 }
 0x1c6   : > { %v520_v42 = vpop.f32.mrf.mxu2 }
 0x1c7   : > { %v485_v43 = vpop.f32.mrf.mxu1  ;;  %v521_v3 = vadd.f32 %v1001_v54, %v520_v42 }
 0x1c8   : > { %v486_v55 = vadd.f32 %v1000_v46, %v485_v43 }
 0x1c9   : > { %v532_v10 = vmul.f32 %v521_v3, %v394_v2  ;;  %v758_v3 = vld [vmem:[%s1548_s7 + $0x48] sm:$0xff] }
 0x1ca   : > { %v495_v1 = vmul.f32 %v486_v55, %v395_v58 }
 0x1ce   : > { %v523_v44 = vpop.f32.mrf.mxu2 }
 0x1cf   : > { %v488_v45 = vpop.f32.mrf.mxu1  ;;  %v524_v61 = vadd.f32 %v1001_v54, %v523_v44 }
 0x1d0   : > { %v489_v51 = vadd.f32 %v1000_v46, %v488_v45 }
 0x1d1   : > { %v533_v6 = vmul.f32 %v524_v61, %v395_v58  ;;  %v760_v61 = vld [vmem:[%s1548_s7 + $0x58] sm:$0xff] }
 0x1d2   : > { %v496_v56 = vmul.f32 %v489_v51, %v396_v53  ;;  %v1003_v51 = vld [vmem:[#allocation5 + $0x6] ss:$0 sm:$0xff] }
 0x1d6   : > { %v526_v47 = vpop.f32.mrf.mxu2 }
 0x1d7   : > { %v491_v48 = vpop.f32.mrf.mxu1  ;;  %v527_v59 = vadd.f32 %v1001_v54, %v526_v47 }
 0x1d8   : > { %v492_v50 = vadd.f32 %v1000_v46, %v491_v48 }
 0x1d9   : > { %v534_v4 = vmul.f32 %v527_v59, %v396_v53  ;;  %v1005_v59 = vld [vmem:[#allocation5 + $0x8] ss:$0 sm:$0xff] }
 0x1da   : > { %v497_v52 = vmul.f32 %v492_v50, %v397_v49 }
 0x1dc   : > { %914 = vmatpush.xpose.msk.msra.mxu3 %vm398_vm0, %v497_v52 }
 0x1de   : > { %v529_v57 = vpop.f32.mrf.mxu2 }
 0x1df   : > { %v530_v60 = vadd.f32 %v1001_v54, %v529_v57  ;;  %v1004_v54 = vld [vmem:[#allocation5 + $0x7] ss:$0 sm:$0xff] }
 0x1e0   : > { %915 = vmatpush.xpose.msk.msra.mxu3 %vm398_vm0, %v496_v56  ;;  %v763_v57 = vld [vmem:[%s1548_s7 + $0x70] sm:$0xff] }
 0x1e1   : > { %v535_v62 = vmul.f32 %v530_v60, %v397_v49  ;;  %v761_v60 = vld [vmem:[%s1548_s7 + $0x60] sm:$0xff] }
 0x1e3   : > { %592 = vmatpush.msrb.mxu0 %v535_v62 }
 0x1e4   : > { %916 = vmatpush.xpose.msk.msra.mxu3 %vm398_vm0, %v495_v1  ;;  %v759_v1 = vld [vmem:[%s1548_s7 + $0x50] sm:$0xff] }
 0x1e5   : > { %593 = vmatpush.msrb.mxu0 %v534_v4 }
 0x1e7   : > { %594 = vmatpush.msrb.mxu0 %v533_v6 }
 0x1e8   : > { %917 = vmatpush.xpose.msk.msra.mxu3 %vm398_vm0, %v494_v9 }
 0x1e9   : > { %595 = vmatpush.msrb.mxu0 %v532_v10  ;;  %v755_v10 = vld [vmem:[%s1548_s7 + $0x30] sm:$0xff] }
 0x1eb   : > { %612 = vmatpush.msra.mxu0 %v397_v49  ;;  %918 = vmatmul.msk.f32.vlgmr.msra.gmra.mxu3 %vm398_vm0, %v458_v11 }
 0x1ec   : > { %645 = vmatpush.msrb.mxu3 %v628_v18  ;;  %v750_v18 = vld [vmem:[%s1548_s7 + $0x8] sm:$0xff] }
 0x1ed   : > { %613 = vmatpush.msra.mxu0 %v396_v53 }
 0x1ee   : > { %646 = vmatpush.msrb.mxu3 %v627_v19 }
 0x1ef   : > { %614 = vmatpush.msra.mxu0 %v395_v58  ;;  %v762_v58 = vld [vmem:[%s1548_s7 + $0x68] sm:$0xff] }
 0x1f0   : > { %647 = vmatpush.msrb.mxu3 %v626_v20  ;;  %v749_v20 = vld [vmem:[%s1548_s7] sm:$0xff] }
 0x1f1   : > { %615 = vmatpush.msra.mxu0 %v394_v2 }
 0x1f2   : > { %648 = vmatpush.msrb.mxu3 %v625_v21 }
 0x26e   : > { %v568_v12 = vpop.f32.mrf.mxu3 }
 0x26f   : > { %v571_v13 = vsel %vm398_vm0, %v568_v12, -inf }
 0x270   : > { %572 = vmax.xlane.f32.xlu1 %v571_v13  ;;  %v753_v13 = vld [vmem:[%s1548_s7 + $0x20] sm:$0xff] }
 0x2e3   : > { %v573_v14 = vpop.xlane.xlu1 %572 }
 0x2e4   : > { %v574_v15 = vsub.f32 %v568_v12, %v573_v14  ;;  %v754_v12 = vld [vmem:[%s1548_s7 + $0x28] sm:$0xff]  ;;  %v752_v14 = vld [vmem:[%s1548_s7 + $0x18] sm:$0xff] }
 0x2e6   : > { %v575_v16 = vmul.f32 1.442695, %v574_v15  ;;  %v751_v15 = vld [vmem:[%s1548_s7 + $0x10] sm:$0xff] }
 0x2e8   : > { %1011 = vpow2.f32 %v575_v16 }
 0x2ee   : > { %v1012_v17 = vpop.eup %1011 }
 0x2ef   : > { %919 = vmatmul.msk.f32.vlgmr.msrb.gmra.mxu0 %vm398_vm0, %v1012_v17 }
 0x2f0   : > { %700 = vmatpush.msrb.mxu0 %v683_v39 }
 0x2f7   : > { %920 = vmatmul.msk.f32.vlgmr.msra.gmra.mxu0 %vm398_vm0, %v1012_v17 }
 0x36c   : > { %v597_v22 = vpop.f32.mrf.mxu0 }
 0x374   : > { %v617_v23 = vpop.f32.mrf.mxu0 }
 0x375   : > { %1013 = vrcp.f32 %v617_v23 }
 0x37b   : > { %v1014_v24 = vpop.eup %1013 }
 0x37c   : > { %v621_v25 = vmul.f32 %v1014_v24, %v617_v23 }
 0x37e   : > { %v622_v26 = vsub.f32 2.0, %v621_v25 }
 0x380   : > { %v623_v27 = vmul.f32 %v1014_v24, %v622_v26 }
 0x382   : > { %v624_v28 = vmul.f32 %v623_v27, %v597_v22 }
 0x384   : > { %921 = vmatmul.msk.f32.vlgmr.msrb.gmra.mxu3 %vm398_vm0, %v624_v28 }
 0x407   : > { %v650_v30 = vpop.f32.mrf.mxu3 }
 0x408   : > { %v651_v31 = vadd.f32 %v1002_v29, %v650_v30 }
 0x40a   : > { %v1429_v32 = vadd.f32 %v651_v31, %v1352_v0  ;;  %v682_v0 = vld [vmem:[%s1547_s6 + $0x10] sm:$0xff] }
 0x40b   : > { %701 = vmatpush.msrb.mxu0 %v682_v0 }
 0x40c   : > { %v654_v33 = vsel %vm398_vm0, %v1429_v32, 0.0 }
 0x40d   : > { %655 = vadd.xlane.f32.xlu1 %v654_v33  ;;  %702 = vmatpush.msrb.mxu0 %v681_v40 }
 0x40f   : > { %703 = vmatpush.msrb.mxu0 %v680_v41 }
 0x480   : > { %v656_v34 = vpop.xlane.xlu1 %655 }
 0x481   : > { %v657_v35 = vmul.f32 %v656_v34, %v1356_v8 }
 0x483   : > { %v658_v36 = vsub.f32 %v1429_v32, %v657_v35 }
 0x485   : > { %v659_v37 = vmul.f32 %v658_v36, %v658_v36 }
 0x487   : > { %v660_v38 = vsel %vm398_vm0, %v659_v37, 0.0 }
 0x488   : > { %661 = vadd.xlane.f32.xlu2 %v660_v38 }
 0x4fb   : > { %v662_v42 = vpop.xlane.xlu2 %661 }
 0x4fc   : > { %v663_v43 = vmul.f32 %v662_v42, %v1356_v8  ;;  %v764_v8 = vld [vmem:[%s1548_s7 + $0x78] sm:$0xff] }
 0x4fd   : > { %766 = vmatpush.msrb.mxu1 %v764_v8 }
 0x4fe   : > { %v664_v44 = vadd.f32 1e-05, %v663_v43 }
 0x4ff   : > { %767 = vmatpush.msrb.mxu1 %v763_v57 }
 0x500   : > { %1015 = vrsqrt.f32 %v664_v44  ;;  %vm671_vm6 = vweird.f32 %v664_v44 }
 0x501   : > { %768 = vmatpush.msrb.mxu1 %v762_v58 }
 0x503   : > { %769 = vmatpush.msrb.mxu1 %v761_v60 }
 0x505   : > { %770 = vmatpush.msrb.mxu1 %v760_v61 }
 0x506   : > { %v1016_v45 = vpop.eup %1015 }
 0x507   : > { %v666_v46 = vmul.f32 %v1016_v45, %v664_v44  ;;  %vm672_vm5 = vweird.f32 %v1016_v45  ;;  %771 = vmatpush.msrb.mxu1 %v759_v1 }
 0x508   : > { %vm673_vm7 = vmor %vm671_vm6, %vm672_vm5 }
 0x509   : > { %v667_v47 = vmul.f32 %v1016_v45, %v666_v46  ;;  %772 = vmatpush.msrb.mxu1 %v758_v3 }
 0x50b   : > { %v668_v48 = vmul.f32 0.5, %v667_v47  ;;  %773 = vmatpush.msrb.mxu1 %v757_v5 }
 0x50d   : > { %v669_v49 = vsub.f32 1.5, %v668_v48  ;;  %774 = vmatpush.msrb.mxu1 %v756_v7  ;;  %v1006_v48 = vld [vmem:[#allocation5 + $0x9] ss:$0 sm:$0xff] }
 0x50f   : > { %v670_v50 = vmul.f32 %v1016_v45, %v669_v49  ;;  %775 = vmatpush.msrb.mxu1 %v755_v10 }
 0x511   : > { %v674_v52 = vsel %vm673_vm7, %v1016_v45, %v670_v50  ;;  %776 = vmatpush.msrb.mxu1 %v754_v12 }
 0x512   : > { %v675_v53 = vmul.f32 %v674_v52, %v658_v36 }
 0x513   : > { %777 = vmatpush.msrb.mxu1 %v753_v13 }
 0x514   : > { %v677_v55 = vmul.f32 %v1003_v51, %v675_v53 }
 0x515   : > { %778 = vmatpush.msrb.mxu1 %v752_v14 }
 0x516   : > { %v679_v56 = vadd.f32 %v1004_v54, %v677_v55 }
 0x517   : > { %779 = vmatpush.msrb.mxu1 %v751_v15 }
 0x518   : > { %922 = vmatmul.msk.f32.vlgmr.msrb.gmra.mxu0 %vm398_vm0, %v679_v56 }
 0x519   : > { %780 = vmatpush.msrb.mxu1 %v750_v18 }
 0x51b   : > { %781 = vmatpush.msrb.mxu1 %v749_v20 }
 0x595   : > { %v705_v62 = vpop.f32.mrf.mxu0 }
 0x596   : > { %v1465_v63 = vadd.f32 %v1005_v59, %v705_v62 }
 0x598   : > { %v709_v2 = vmul.f32 0.70710677, %v1465_v63  ;;  %v708_v45 = vmul.f32 0.5, %v1465_v63 }
 0x59a   : > { %vm710_vm8 = vcmp.ge.f32.partialorder %v709_v2, 0.0  ;;  %v711_v4 = vsub.f32 0.0, %v709_v2 }
 0x59c   : > { %v712_v6 = vsel %vm710_vm8, %v709_v2, %v711_v4 }
 0x59d   : > { %v713_v9 = vmul.f32 0.3275911, %v712_v6  ;;  %v739_v27 = vmul.f32 %v712_v6, %v712_v6 }
 0x59f   : > { %v714_v11 = vadd.f32 1.0, %v713_v9  ;;  %v740_v31 = vsub.f32 0.0, %v739_v27 }
 0x5a1   : > { %1017 = vrcp.f32 %v714_v11  ;;  %v726_v21 = vand.u32 2147483648, %v714_v11  ;;  %v724_v23 = vand.u32 2147483647, %v714_v11  ;;  %vm720_vm10 = vweird.f32 %v714_v11 }
 0x5a2   : > { %v741_v35 = vmul.f32 1.442695, %v740_v31 }
 0x5a3   : > { %v727_v25 = vor.u32 1.1754944e-38, %v726_v21  ;;  %vm725_vm12 = vcmp.eq.f32.partialorder %v724_v23, 8.507059e+37 }
 0x5a4   : > { %1019 = vpow2.f32 %v741_v35 }
 0x5a7   : > { %v1018_v16 = vpop.eup %1017 }
 0x5a8   : > { %v716_v17 = vmul.f32 %v1018_v16, %v714_v11  ;;  %vm721_vm9 = vweird.f32 %v1018_v16 }
 0x5a9   : > { %vm722_vm11 = vmor %vm720_vm10, %vm721_vm9 }
 0x5aa   : > { %v717_v19 = vsub.f32 1.0, %v716_v17  ;;  %v1020_v40 = vpop.eup %1019 }
 0x5ac   : > { %v718_v22 = vmul.f32 %v1018_v16, %v717_v19 }
 0x5ae   : > { %v719_v24 = vadd.f32 %v1018_v16, %v718_v22 }
 0x5b0   : > { %v723_v26 = vsel %vm722_vm11, %v1018_v16, %v719_v24 }
 0x5b1   : > { %v728_v28 = vsel %vm725_vm12, %v727_v25, %v723_v26 }
 0x5b2   : > { %v730_v29 = vmul.f32 1.0614054, %v728_v28 }
 0x5b4   : > { %v731_v30 = vadd.f32 -1.4531521, %v730_v29 }
 0x5b6   : > { %v732_v33 = vmul.f32 %v731_v30, %v728_v28 }
 0x5b8   : > { %v733_v34 = vadd.f32 1.4214138, %v732_v33 }
 0x5ba   : > { %v734_v36 = vmul.f32 %v733_v34, %v728_v28 }
 0x5bc   : > { %v735_v37 = vadd.f32 -0.28449672, %v734_v36 }
 0x5be   : > { %v736_v38 = vmul.f32 %v735_v37, %v728_v28 }
 0x5c0   : > { %v737_v39 = vadd.f32 0.2548296, %v736_v38 }
 0x5c2   : > { %v738_v0 = vmul.f32 %v737_v39, %v728_v28 }
 0x5c4   : > { %v743_v41 = vmul.f32 %v1020_v40, %v738_v0 }
 0x5c6   : > { %v744_v42 = vsub.f32 1.0, %v743_v41 }
 0x5c8   : > { %v745_v43 = vsub.f32 0.0, %v744_v42 }
 0x5ca   : > { %v746_v44 = vsel %vm710_vm8, %v744_v42, %v745_v43 }
 0x5cb   : > { %v747_v46 = vadd.f32 1.0, %v746_v44 }
 0x5cd   : > { %v748_v47 = vmul.f32 %v747_v46, %v708_v45 }
 0x5cf   : > { %782 = vmatmul.f32.vlgmr.msrb.gmra.mxu1 %v748_v47 }
 0x64c   : > { %v783_v49 = vpop.f32.mrf.mxu1 }
 0x64d   : > { %v784_v50 = vadd.f32 %v1006_v48, %v783_v49 }
 0x64f   : > { %v786_v51 = vadd.f32 %v784_v50, %v1429_v32 }
 0x651   : > { %787 = vst.msk [vmem:[%s382_s27] sm:$0xff] %vm398_vm0, %v786_v51 }
 0x652   : > { %1138 = shalt.err (!%p1135_p9)
}
 0x653   : > { %937 = dma.vmem_to_hbm [thread:$0]  (%p1307_p4), %s802_s22, 128, %s804_s23, %s789_s24  }
 0x654 PF: > { %s815_s19 = sand.u32 1, %s1169_s30   ;;  %p1564_p10 = scmp.ge.s32.totalorder %s1181_s12, 2 }
 0x655   : > { %s816_s8 = scalar_lea.sflag [#allocation4], %s815_s19 }
 0x656   : > { %p951_p13 = pnand %p1564_p10, %p1311_p6 }
 0x658   : > { %p952_p11 = pneg %p951_p13 }
 0x65a   : > { %1164 = dma.done.wait (%p952_p11), %s816_s8, 128  }
 0x65b   : > { %1166 = vsyncadd (%p952_p11), %s816_s8, 4294967168  ;;  %s1565_s17 = sld [smem:[#allocation12_spill]]  ;;  %p23_p0 = scmp.ge.s32.totalorder %s1281_s28, 4  }
 0x65c   : > { %s1566_s11 = sld [smem:[#allocation13_spill]]  ;;  %s1567_s30 = smov %s1173_s10 }
 0x65d   : > { %s1569_s12 = smov %s1281_s28  ;;  %25 = sbr.rel (!%p23_p0) target bundleno = 9 (0x9), region = 109 }
 0x661   : > { %s1568_s10 = smov %s1565_s17 }
 0x662   :  { %822 = vsyncpa [#allocation3], 1 }
 0x663   :  { %824 = vsyncpa [#allocation3 + $0x1], 1 }
 0x664   :  { %825 = vsyncpa [#allocation6], 1 }
 0x665   :  { %826 = vsyncpa [#allocation4], 1 }
 0x666   :  { %828 = vsyncpa [#allocation4 + $0x1], 1 }

</bundles_post_ra>
